<compile_context>
chip_gen: v7x
topology: tpu7x:2x2x1
jax: 0.10.0
libtpu: 0.0.40
codegen_flags: <defaults>
</compile_context>

<pallas_src>
import jax
import jax.numpy as jnp
from jax import lax
from jax.experimental import pallas as pl
from jax.experimental.pallas import tpu as pltpu

EPS = 1e-12                      # torch.nn.functional.normalize default eps
_LANE = 128                      # TPU lane width
_SUBLANE = 8                     # TPU sublane count (f32)
_VMEM_LIMIT = 32 * 1024 * 1024   # explicit scoped-VMEM limit; fits every gen


def _budgets():
    """Return (per-block byte budget, vmem_limit_bytes), generation-aware."""
    try:
        phys = int(pltpu.get_tpu_info().vmem_capacity_bytes)
    except Exception:            # pragma: no cover - be conservative (v7x: 64 MiB)
        phys = 64 * 1024 * 1024
    vmem_limit = max(16 * 1024 * 1024, min(_VMEM_LIMIT, phys // 2))
    # in + out blocks, double-buffered (4 live blocks) + compiler scratch headroom.
    return vmem_limit // 5, vmem_limit


def _split_for_two_steps(batch, tb, spatial, st, gran):
    """If the grid would have a single step, split so both v7x TCs get work."""
    if pl.cdiv(batch, tb) * pl.cdiv(spatial, st) >= 2:
        return tb, st
    if spatial > gran:           # split spatially; tile stays a multiple of gran
        st = pl.cdiv(pl.cdiv(spatial, 2), gran) * gran
    elif batch > 1:
        tb = pl.cdiv(tb, 2)
    return tb, st


def _l2_normalize_kernel(x_ref, o_ref):
    """L2-normalize over axis=1 of the current block (works for 3-D or 4-D tiles)."""
    x = x_ref[...]
    xf = x.astype(jnp.float32)
    ss = jnp.sum(xf * xf, axis=1, keepdims=True)         # reduced (tb, 1, ...) slab
    ss = jnp.maximum(ss, EPS * EPS)                       # == max(||x||, eps)**2
    inv = lax.rsqrt(ss)                                   # EUP slot (otherwise idle)
    inv = inv * (1.5 - 0.5 * ss * inv * inv)              # Newton step -> full f32 acc.
    if x.dtype == jnp.float32:
        o_ref[...] = xf * inv
    else:
        # Don't hold a full f32 copy of the tile just for the store.
        o_ref[...] = (x * inv.astype(x.dtype)).astype(o_ref.dtype)


def normalize(x):
    """L2-normalize along dim=1 of an NCHW tensor (== F.normalize(x, p=2, dim=1))."""
    # TODO(synk): only p=2 (the module's default) is implemented.
    B, C, H, W = x.shape
    HW = H * W
    itemsize = jnp.dtype(x.dtype).itemsize
    block_budget, vmem_limit = _budgets()

    if HW % _LANE == 0:
        # --- sublane-dense layout: (B, C, HW/128, 128); channel is a major axis.
        rows = HW // _LANE
        xr = x.reshape(B, C, rows, _LANE)
        row_bytes = C * _LANE * itemsize                  # one spatial row, all C
        rows_fit = max(1, block_budget // row_bytes)
        if rows_fit >= rows:
            rows_t = rows
        else:
            rows_t = min(rows, max(_SUBLANE, (rows_fit // _SUBLANE) * _SUBLANE))
        tb = 1
        if rows_t == rows:                                # whole spatial fits: fold batch
            tb = max(1, min(B, block_budget // (rows * row_bytes)))
        tb, rows_t = _split_for_two_steps(B, tb, rows, rows_t, _SUBLANE)
        grid = (pl.cdiv(B, tb), pl.cdiv(rows, rows_t))
        block = (tb, C, rows_t, _LANE)
        index_map = lambda b, s: (b, 0, s, 0)
        flat_shape = (B, C, rows, _LANE)
    else:
        # --- lane-dense fallback: (B, C, HW); C sits on (8-padded) sublanes.
        xr = x.reshape(B, C, HW)
        c_pad = pl.cdiv(C, _SUBLANE) * _SUBLANE           # real VMEM rows per slab
        lane_tile_bytes = c_pad * _LANE * itemsize
        lanes_fit = max(1, block_budget // lane_tile_bytes)
        if lanes_fit >= pl.cdiv(HW, _LANE):
            hw_t = HW                                     # full dim (always legal)
        else:
            hw_t = lanes_fit * _LANE                      # multiple of 128
        tb = 1
        if hw_t == HW:                                    # whole spatial fits: fold batch
            tb = max(1, min(B, block_budget // (c_pad * hw_t * itemsize)))
        tb, hw_t = _split_for_two_steps(B, tb, HW, hw_t, _LANE)
        grid = (pl.cdiv(B, tb), pl.cdiv(HW, hw_t))
        block = (tb, C, hw_t)
        index_map = lambda b, s: (b, 0, s)
        flat_shape = (B, C, HW)

    out = pl.pallas_call(
        _l2_normalize_kernel,
        out_shape=jax.ShapeDtypeStruct(flat_shape, x.dtype),
        grid_spec=pltpu.PrefetchScalarGridSpec(
            num_scalar_prefetch=0,
            grid=grid,
            in_specs=[pl.BlockSpec(block, index_map)],
            # NOTE: if a v7x profile still shows exposed DMA, bump the input
            # spec to pipeline_mode=pl.Buffered(3) rather than shrinking blocks.
            out_specs=pl.BlockSpec(block, index_map),
        ),
        compiler_params=pltpu.CompilerParams(
            dimension_semantics=("parallel", "parallel"),
            vmem_limit_bytes=vmem_limit,
        ),
    )(xr)
    return out.reshape(B, C, H, W)


if __name__ == "__main__":
    key = jax.random.PRNGKey(0)
    x = jax.random.normal(key, (2, 4, 16, 16), dtype=jnp.float32)

    y = normalize(x)
    jax.block_until_ready(y)

    # Reference check against plain-JAX F.normalize(x, p=2, dim=1).
    norm_ref = jnp.sqrt(jnp.sum(x * x, axis=1, keepdims=True))
    y_ref = x / jnp.maximum(norm_ref, EPS)
    assert y.shape == x.shape and y.dtype == x.dtype
    assert jnp.allclose(y, y_ref, atol=1e-6, rtol=1e-6)

    print("KERNEL_OK")
</pallas_src>

<mosaic_0001>
module attributes {stable_mosaic.version = 11 : i64} {
  func.func @_l2_normalize_kernel(%arg0: i32, %arg1: i32, %arg2: memref<1x4x2x128xf32, #tpu.memory_space<vmem>>, %arg3: memref<1x4x2x128xf32, #tpu.memory_space<vmem>>) attributes {dimension_semantics = [#tpu.dimension_semantics<parallel>, #tpu.dimension_semantics<parallel>], iteration_bounds = array<i64: 2, 1>, scalar_prefetch = 0 : i64, scratch_operands = 0 : i64, tpu.core_type = #tpu.core_type<tc>, window_params = [{transform_indices = @transform_0, window_bounds = array<i64: 1, 4, 2, 128>}, {transform_indices = @transform_1, window_bounds = array<i64: 1, 4, 2, 128>}]} {
    %c0 = arith.constant 0 : index
    %c0_0 = arith.constant 0 : index
    %c0_1 = arith.constant 0 : index
    %c0_2 = arith.constant 0 : index
    %0 = vector.load %arg2[%c0, %c0_0, %c0_1, %c0_2] : memref<1x4x2x128xf32, #tpu.memory_space<vmem>>, vector<1x4x2x128xf32>
    %1 = arith.mulf %0, %0 : vector<1x4x2x128xf32>
    %cst = arith.constant dense<0.000000e+00> : vector<1x2x128xf32>
    %2 = vector.multi_reduction <add>, %1, %cst [1] : vector<1x4x2x128xf32> to vector<1x2x128xf32>
    %3 = vector.shape_cast %2 : vector<1x2x128xf32> to vector<1x1x2x128xf32>
    %cst_3 = arith.constant 1.000000e-24 : f32
    %4 = vector.broadcast %cst_3 : f32 to vector<1x1x2x128xf32>
    %5 = arith.maximumf %3, %4 : vector<1x1x2x128xf32>
    %6 = math.rsqrt %5 : vector<1x1x2x128xf32>
    %cst_4 = arith.constant 5.000000e-01 : f32
    %7 = vector.broadcast %cst_4 : f32 to vector<1x1x2x128xf32>
    %8 = arith.mulf %7, %5 : vector<1x1x2x128xf32>
    %9 = arith.mulf %8, %6 : vector<1x1x2x128xf32>
    %10 = arith.mulf %9, %6 : vector<1x1x2x128xf32>
    %cst_5 = arith.constant 1.500000e+00 : f32
    %11 = vector.broadcast %cst_5 : f32 to vector<1x1x2x128xf32>
    %12 = arith.subf %11, %10 : vector<1x1x2x128xf32>
    %13 = arith.mulf %6, %12 : vector<1x1x2x128xf32>
    %14 = vector.broadcast %13 : vector<1x1x2x128xf32> to vector<1x4x2x128xf32>
    %15 = arith.mulf %0, %14 : vector<1x4x2x128xf32>
    %c0_6 = arith.constant 0 : index
    %c0_7 = arith.constant 0 : index
    %c0_8 = arith.constant 0 : index
    %c0_9 = arith.constant 0 : index
    %16 = vector.load %arg3[%c0_6, %c0_7, %c0_8, %c0_9] : memref<1x4x2x128xf32, #tpu.memory_space<vmem>>, vector<1x4x2x128xf32>
    tpu.vector_store %arg3[%c0_6, %c0_7, %c0_8, %c0_9], %15 {strides = array<i32>} : memref<1x4x2x128xf32, #tpu.memory_space<vmem>>, vector<1x4x2x128xf32>,
    return
  }
  func.func @transform_0(%arg0: i32, %arg1: i32) -> (i32, i32, i32, i32) {
    %c0_i32 = arith.constant 0 : i32
    %c0_i32_0 = arith.constant 0 : i32
    %c0_i32_1 = arith.constant 0 : i32
    return %arg0, %c0_i32, %arg1, %c0_i32_0 : i32, i32, i32, i32
  }
  func.func @transform_1(%arg0: i32, %arg1: i32) -> (i32, i32, i32, i32) {
    %c0_i32 = arith.constant 0 : i32
    %c0_i32_0 = arith.constant 0 : i32
    %c0_i32_1 = arith.constant 0 : i32
    return %arg0, %c0_i32, %arg1, %c0_i32_0 : i32, i32, i32, i32
  }
}

</mosaic_0001>

<bundles_post_ra>
// kernel: tpu_custom_call.1
= control target key start
LH: loop header
LB: loop body
LE: loop exit
PB: predicated region body
PF: predicated region fallthrough
CT: control target
= control target key end

     0   :  { %6 = vsyncpa [#allocation3], 0  ;;  %s673_s0 = inlined_call_operand.hbm [shape: f32[2,4,2,128], index: 0, kind: input, shape index: {}]   ;;  %s674_s1 = inlined_call_operand.hbm [shape: f32[2,4,2,128], index: 1, kind: output, shape index: {}]  }
   0x1   :  { %8 = vsyncpa [#allocation3 + $0x1], 0 }
   0x2   :  { %9 = vsyncpa [#allocation4], 0 }
   0x3   :  { %11 = vsyncpa [#allocation4 + $0x1], 0  ;;  %s498_s6 = smov 0   ;;  %s500_s7 = smov 0  }
   0x4   :  { %s502_s8 = smov 0   ;;  %s504_s9 = smov 0  }
   0x5   :  { %s506_s10 = smov 0   ;;  %s508_s11 = smov 0  }
   0x6 LB: > { %s283_s12 = sadd.s32 4294967295, %s480_s11   ;;  %s284_s13 = sadd.s32 4294967294, %s480_s11   ;;  %s480_s11 = sphi %s508_s11, %s17_s11   ;;  %s476_s10 = sphi %s506_s10, %s689_s10   ;;  %s472_s9 = sphi %s504_s9, %s688_s9   ;;  %s468_s8 = sphi %s502_s8, %s687_s8   ;;  %s464_s7 = sphi %s500_s7, %s686_s7   ;;  %s460_s6 = sphi %s498_s6, %s685_s6  }
   0x7   : > { %s29_s14 = sadd.s32 1, %s476_s10  ;;  %s38_s15 = sadd.s32 1, %s468_s8 }
   0x8   : > { %p31_p0 = scmp.ge.s32.totalorder %s29_s14, 2  ;;  %p45_p1 = scmp.ne.s32.totalorder %s468_s8, %s464_s7 }
   0x9   : > { %p46_p2 = scmp.eq.s32.totalorder %s480_s11, 0  ;;  %p51_p3 = scmp.ne.s32.totalorder %s464_s7, %s460_s6 }
   0xa   : > { %s691_s14 = smov (%p31_p0, %s29_s14), 0  ;;  %p52_p5 = scmp.eq.s32.totalorder %s283_s12, 0 }
   0xb   : > { %p539_p4 = por %p46_p2, %p45_p1  ;;  %s33_s17 = ssub.s32 %s476_s10, %s691_s14 }
   0xc   : > { %p77_p6 = scmp.eq.s32.totalorder %s283_s12, 1  ;;  %p36_p7 = scmp.eq.s32.totalorder %s33_s17, 0 }
   0xd   : > { %p545_p8 = por %p52_p5, %p51_p3  ;;  %p83_p10 = scmp.eq.s32.totalorder %s284_s13, 1 }
   0xe   : > { %p549_p9 = por %p77_p6, %p45_p1  ;;  %p312_p13 = scmp.lt.s32.totalorder %s480_s11, 2 }
   0xf   : > { %s554_s20 = scalar_select %p36_p7, %s468_s8, %s38_s15  }
  0x10   : > { %s678_s19 = scalar_select %p549_p9, 1, 0 }
  0x11   : > { %p556_p11 = por %p83_p10, %p51_p3  ;;  %s103_s22 = sand.u32 1, %s468_s8  }
  0x12   : > { %s287_s23 = sshll.u32 %s103_s22, 3  ;;  %s298_s24 = sshll.u32 %s476_s10, 7 }
  0x13   : > { %s679_s21 = scalar_select %p556_p11, 1, 0 }
  0x14   : > { %s567_s27 = scalar_lea.hbm %s673_s0, %s298_s24  ;;  %s107_s28 = scalar_lea.vmem [#allocation2], %s287_s23 }
  0x15   : > { %s115_s29 = sshll.u32 %s107_s28, 4  ;;  %p573_p0 = pnand %p312_p13, %p539_p4  ;;  %s569_s29 = int_to_ptr.vmem [resolvable:$true] %s115_s29 }
  0x16   : > { %s578_s2 = scalar_lea.sflag [#allocation3], %s103_s22  ;;  %s368_s3 = scalar_lea.hbm %s567_s27, 128 }
  0x17   : > { %p369_p2 = scmp.ne.s32.totalorder %s567_s27, %s368_s3  ;;  %p370_p3 = pneg %p573_p0 }
  0x18   : > { %s373_s12 = scalar_lea.hbm %s673_s0, 256  ;;  %p374_p4 = scmp.lt.u32.totalorder %s567_s27, %s673_s0 }
  0x19   : > { %p371_p5 = pnand %p370_p3, %p369_p2  ;;  %p375_p7 = scmp.lt.u32.totalorder %s373_s12, %s368_s3 }
  0x1a   : > { %p377_p13 = scmp.lt.u32.totalorder %s368_s3, %s567_s27 }
  0x1b   : > { %p372_p6 = pneg %p371_p5  ;;  %p376_p10 = por %p375_p7, %p374_p4 }
  0x1d   : > { %p378_p12 = por %p377_p13, %p376_p10 }
  0x1f   : > { %p379_p1 = pnand %p378_p12, %p372_p6 }
  0x21   : > { %382 = shalt.err (!%p379_p1)
}
  0x22   : > { %s383_s16 = scalar_lea.vmem %s569_s29, 128  ;;  %s482_s17 = smov [#allocation2]  }
  0x23   : > { %p384_p2 = scmp.ne.s32.totalorder %s569_s29, %s383_s16  ;;  %s388_s22 = sshll.u32 %s482_s17, 4  ;;  %s389_s22 = int_to_ptr.vmem [resolvable:$false] %s388_s22 }
  0x24   : > { %s390_s23 = scalar_lea.vmem %s389_s22, 256  ;;  %p391_p9 = scmp.lt.s32.totalorder %s569_s29, %s389_s22 }
  0x25   : > { %p386_p5 = pnand %p384_p2, %p370_p3  ;;  %p392_p4 = scmp.lt.s32.totalorder %s390_s23, %s383_s16 }
  0x27   : > { %p387_p11 = pneg %p386_p5  ;;  %p393_p7 = por %p392_p4, %p391_p9 }
  0x29   : > { %p394_p10 = pnand %p393_p7, %p387_p11 }
  0x2b   : > { %397 = shalt.err (!%p394_p10)
}
  0x2c   : > { %s483_s24 = smov 32   ;;  %s484_s25 = smov 2  }
  0x2d   : > { %307 = dma.hbm_to_vmem [thread:$0]  (!%p573_p0), %s567_s27, 128, %s569_s29, %s578_s2, %s483_s24, %s483_s24, %s484_s25  }
  0x2e   : > { %p123_p12 = scmp.lt.s32.totalorder %s480_s11, 3  ;;  %p681_p1 = scmp.ge.s32.totalorder %s480_s11, 1 }
  0x30   : > { %p124_p3 = pnand %p681_p1, %p123_p12 }
  0x31   : > { %s610_s26 = sand.u32 (!%p124_p3), 1, %s464_s7  }
  0x32   : > { %127 = sbr.rel (%p124_p3) target bundleno = 107 (0x6b), region = 24  ;;  %s291_s28 = sshll.u32 (!%p124_p3), %s610_s26, 3 }
  0x33   : > { %s130_s3 = scalar_lea.sflag (!%p124_p3), [#allocation3], %s610_s26  ;;  %s133_s4 = scalar_lea.vmem (!%p124_p3), [#allocation2], %s291_s28 }
  0x39   : > { %451 = dma.done.wait (%p545_p8), %s130_s3, 128  }
  0x3a   : > { %453 = vsyncadd (%p545_p8), %s130_s3, 4294967168  ;;  %vm160_vm0 = vcmask 1041408   ;;  %v152_v0 = vld [vmem:[%s133_s4] sm:$0x3]  ;;  %v153_v1 = vld [vmem:[%s133_s4 + $0x2] sm:$0x3] }
  0x3b   : > { %v154_v2 = vld [vmem:[%s133_s4 + $0x4] sm:$0x3]  ;;  %v155_v3 = vld [vmem:[%s133_s4 + $0x6] sm:$0x3]  ;;  %v156_v4 = vmul.f32 %v152_v0, %v152_v0  ;;  %v157_v5 = vmul.f32 %v153_v1, %v153_v1  ;;  %s151_s18 = scalar_lea.vmem [#allocation5], %s291_s28  ;;  %s299_s29 = sshll.u32 %s472_s9, 7 }
  0x3c   : > { %v158_v6 = vmul.f32 %v154_v2, %v154_v2  ;;  %v159_v7 = vmul.f32 %v155_v3, %v155_v3  ;;  %s198_s27 = sshll.u32 %s151_s18, 4  ;;  %s624_s5 = scalar_lea.hbm %s674_s1, %s299_s29  ;;  %s619_s27 = int_to_ptr.vmem [resolvable:$true] %s198_s27 }
  0x3d   : > { %v161_v8 = vsel %vm160_vm0, %v156_v4, 0.0  ;;  %v162_v9 = vsel %vm160_vm0, %v157_v5, 0.0  ;;  %s184_s9 = scalar_lea.sflag [#allocation4], %s610_s26  ;;  %s398_s12 = scalar_lea.vmem %s619_s27, 128 }
  0x3e   : > { %v164_v10 = vsel %vm160_vm0, %v158_v6, 0.0  ;;  %v163_v11 = vadd.f32 %v162_v9, %v161_v8  ;;  %v166_v12 = vsel %vm160_vm0, %v159_v7, 0.0  ;;  %p399_p8 = scmp.ne.s32.totalorder %s619_s27, %s398_s12  ;;  %p682_p9 = scmp.ne.s32.totalorder %s678_s19, 0 }
  0x3f   : > { %s485_s13 = smov [#allocation5]  }
  0x40   : > { %v165_v13 = vadd.f32 %v164_v10, %v163_v11  ;;  %p400_p11 = pnand %p399_p8, %p682_p9  ;;  %s402_s15 = sshll.u32 %s485_s13, 4  ;;  %s403_s15 = int_to_ptr.vmem [resolvable:$false] %s402_s15 }
  0x41   : > { %s404_s16 = scalar_lea.vmem %s403_s15, 256  ;;  %p405_p6 = scmp.lt.s32.totalorder %s619_s27, %s403_s15 }
  0x42   : > { %v167_v14 = vadd.f32 %v166_v12, %v165_v13  ;;  %p401_p0 = pneg %p400_p11  ;;  %p406_p13 = scmp.lt.s32.totalorder %s404_s16, %s398_s12 }
  0x44   : > { %v168_v15 = vmax.f32 %v167_v14, 1e-24  ;;  %p407_p2 = por %p406_p13, %p405_p6 }
  0x46   : > { %366 = vrsqrt.f32 %v168_v15  ;;  %v170_v16 = vmul.f32 0.5, %v168_v15  ;;  %p408_p5 = pnand %p407_p2, %p401_p0 }
  0x50   : > { %v367_v17 = vpop.eup %366 }
  0x51   : > { %v171_v18 = vmul.f32 %v367_v17, %v170_v16 }
  0x53   : > { %v172_v19 = vmul.f32 %v367_v17, %v171_v18 }
  0x55   : > { %v173_v20 = vsub.f32 1.5, %v172_v19 }
  0x57   : > { %v174_v21 = vmul.f32 %v367_v17, %v173_v20 }
  0x59   : > { %v175_v22 = vmul.f32 %v174_v21, %v152_v0  ;;  %v176_v23 = vmul.f32 %v174_v21, %v153_v1  ;;  %v177_v24 = vmul.f32 %v174_v21, %v154_v2  ;;  %v178_v25 = vmul.f32 %v174_v21, %v155_v3 }
  0x5b   : > { %179 = vst [vmem:[%s151_s18] sm:$0x3] %v175_v22  ;;  %180 = vst [vmem:[%s151_s18 + $0x2] sm:$0x3] %v176_v23 }
  0x5c   : > { %181 = vst [vmem:[%s151_s18 + $0x4] sm:$0x3] %v177_v24  ;;  %182 = vst [vmem:[%s151_s18 + $0x6] sm:$0x3] %v178_v25 }
  0x5d   : > { %411 = shalt.err (!%p408_p5)
}
  0x5e   : > { %s412_s17 = scalar_lea.hbm %s624_s5, 128  ;;  %s416_s24 = scalar_lea.hbm %s674_s1, 256 }
  0x5f   : > { %p413_p4 = scmp.ne.s32.totalorder %s624_s5, %s412_s17  ;;  %p417_p12 = scmp.lt.u32.totalorder %s624_s5, %s674_s1 }
  0x60   : > { %p418_p1 = scmp.lt.u32.totalorder %s416_s24, %s412_s17  ;;  %p420_p8 = scmp.lt.u32.totalorder %s412_s17, %s624_s5 }
  0x61   : > { %p414_p7 = pnand %p413_p4, %p682_p9 }
  0x62   : > { %p419_p3 = por %p418_p1, %p417_p12 }
  0x63   : > { %p415_p10 = pneg %p414_p7 }
  0x64   : > { %p421_p11 = por %p420_p8, %p419_p3 }
  0x66   : > { %p422_p0 = pnand %p421_p11, %p415_p10 }
  0x68   : > { %425 = shalt.err (!%p422_p0)
}
  0x69   : > { %s486_s3 = smov 32   ;;  %s487_s4 = smov 2  }
  0x6a   : > { %302 = dma.vmem_to_hbm [thread:$0]  (%p682_p9), %s619_s27, 128, %s624_s5, %s184_s9, %s486_s3, %s486_s3, %s487_s4  }
  0x6b PF: > { %s213_s18 = sand.u32 1, %s460_s6   ;;  %p683_p6 = scmp.ne.s32.totalorder %s679_s21, 0 }
  0x6c   : > { %p684_p13 = scmp.ge.s32.totalorder %s480_s11, 2  ;;  %s214_s29 = scalar_lea.sflag [#allocation4], %s213_s18 }
  0x6e   : > { %p309_p2 = pnand %p684_p13, %p683_p6 }
  0x70   : > { %455 = dma.done.wait (!%p309_p2), %s214_s29, 128  }
  0x71   : > { %457 = vsyncadd (!%p309_p2), %s214_s29, 4294967168  ;;  %s17_s11 = sadd.s32 1, %s480_s11   ;;  %s685_s6 = smov %s464_s7 }
  0x72   : > { %p14_p5 = scmp.ge.s32.totalorder %s17_s11, 4   ;;  %s686_s7 = smov %s468_s8 }
  0x73   : > { %s687_s8 = smov %s554_s20  ;;  %s688_s9 = smov %s476_s10 }
  0x74   : > { %s689_s10 = smov %s691_s14  ;;  %16 = sbr.rel (!%p14_p5) target bundleno = 6 (0x6), region = 69 }
  0x7b   :  { %219 = vsyncpa [#allocation3], 1 }
  0x7c   :  { %221 = vsyncpa [#allocation3 + $0x1], 1 }
  0x7d   :  { %222 = vsyncpa [#allocation4], 1 }
  0x7e   :  { %224 = vsyncpa [#allocation4 + $0x1], 1 }

</bundles_post_ra>
